<compile_context>
chip_gen: v6e
topology: v6e:2x2x1
jax: 0.10.0
libtpu: 0.0.40
codegen_flags: <defaults>
</compile_context>

<pallas_src>
import functools
import math

import jax
import jax.numpy as jnp
from jax.experimental import pallas as pl
from jax.experimental.pallas import tpu as pltpu


def _round_up(x, m):
    return (x + m - 1) // m * m


def _vmem_capacity_bytes():
    try:
        return int(pltpu.get_tpu_info().vmem_capacity_bytes)
    except Exception:
        return 64 << 20  # conservative fallback (v7x per-TC capacity)


def _spec(shape, index_map, single_buffer):
    """BlockSpec; single-buffer constant-index operands when supported."""
    if single_buffer:
        try:
            return pl.BlockSpec(shape, index_map, pipeline_mode=pl.Buffered(1))
        except (TypeError, AttributeError):
            pass
    return pl.BlockSpec(shape, index_map)


def _mlp_kernel(x_ref, w1_ref, b1_ref, w2_ref, b2_ref, o_ref, acc_ref, *, approx_gelu):
    # x_ref: (tm, Cp), w1_ref: (Cp, th), b1_ref: (1, th),
    # w2_ref: (th, Coutp), b2_ref: (1, Coutp), o_ref: (tm, Coutp),
    # acc_ref: (tm, Coutp) f32 scratch (resident across the H grid axis).
    h_idx = pl.program_id(1)

    @pl.when(h_idx == 0)
    def _():
        acc_ref[...] = jnp.zeros_like(acc_ref)

    # fc1 block with f32 accumulation; GELU math stays in f32.
    h = jnp.dot(x_ref[...], w1_ref[...], preferred_element_type=jnp.float32)
    h = h + b1_ref[...].astype(jnp.float32)
    if approx_gelu:
        # tanh approximation -> EUP slot (essentially free under the MXU).
        h = 0.5 * h * (1.0 + jnp.tanh(0.7978845608028654 * (h + 0.044715 * (h * h * h))))
    else:
        # exact GELU (torch.nn.GELU default): 0.5*x*(1+erf(x/sqrt(2)))
        h = 0.5 * h * (1.0 + jax.lax.erf(h * (1.0 / math.sqrt(2.0))))
    # dropout p=0.0 is identity -> no-op.

    # fc2 partial product accumulated into the f32 scratch.
    acc_ref[...] += jnp.dot(h.astype(w2_ref.dtype), w2_ref[...],
                            preferred_element_type=jnp.float32)

    @pl.when(h_idx == pl.num_programs(1) - 1)
    def _():
        o_ref[...] = (acc_ref[...] + b2_ref[...].astype(jnp.float32)).astype(o_ref.dtype)


def pad_mlp_params(w1, b1, w2, b2, *, th=512, compute_dtype=None):
    """Pad parameters ONCE (outside the per-step forward).

    Returns (w1p, b1p, w2p, b2p), dims.  th is the hidden block size that the
    kernel will stream over (clamped / aligned to 128).
    """
    C, H = w1.shape
    Cout = w2.shape[1]
    Cp = _round_up(C, 128)
    th_eff = _round_up(min(th, _round_up(H, 128)), 128)
    Hp = _round_up(H, th_eff)
    Coutp = _round_up(Cout, 128)

    w1p = w1 if (Cp == C and Hp == H) else jnp.pad(w1, ((0, Cp - C), (0, Hp - H)))
    b1p = (b1 if Hp == H else jnp.pad(b1, (0, Hp - H))).reshape(1, Hp)
    w2p = w2 if (Hp == H and Coutp == Cout) else jnp.pad(w2, ((0, Hp - H), (0, Coutp - Cout)))
    b2p = (b2 if Coutp == Cout else jnp.pad(b2, (0, Coutp - Cout))).reshape(1, Coutp)

    if compute_dtype is not None:
        w1p = w1p.astype(compute_dtype)
        w2p = w2p.astype(compute_dtype)

    return (w1p, b1p, w2p, b2p), dict(C=C, H=H, Cout=Cout, th=th_eff)


def _mlp_forward(x, w1p, b1p, w2p, b2p, *, out_features, th, tm,
                 approx_gelu, compute_dtype):
    lead_shape = x.shape[:-1]
    C = x.shape[-1]
    T = math.prod(lead_shape) if lead_shape else 1
    Cp, Hp = w1p.shape
    Coutp = w2p.shape[1]
    num_h = Hp // th
    out_dtype = x.dtype

    if compute_dtype is not None:
        x = x.astype(compute_dtype)

    # Token tile: multiple of 8 sublanes; shrink while padding waste > ~10%.
    tm_eff = _round_up(min(tm, _round_up(T, 8)), 8)
    while tm_eff > 64:
        Tp = _round_up(T, tm_eff)
        if (Tp - T) <= 0.10 * Tp:
            break
        tm_eff = _round_up(tm_eff // 2, 8)
    Tp = _round_up(T, tm_eff)
    num_t = Tp // tm_eff

    x2d = x.reshape(T, C)
    if (Tp, Cp) != (T, C):
        x2d = jnp.pad(x2d, ((0, Tp - T), (0, Cp - C)))

    x_it = jnp.dtype(x2d.dtype).itemsize
    w_it = jnp.dtype(w1p.dtype).itemsize
    o_it = jnp.dtype(out_dtype).itemsize

    # VMEM budget from actual buffers, clamped to real per-core capacity.
    wbuf = 1 if num_h == 1 else 2
    needed = (
        2 * tm_eff * Cp * x_it              # x tile (double-buffered)
        + wbuf * (Cp * th + th) * w_it      # w1 column-block + b1 block
        + wbuf * th * Coutp * w_it          # w2 row-block
        + Coutp * w_it                      # b2 (single-buffered)
        + 2 * tm_eff * Coutp * o_it         # output tile
        + tm_eff * Coutp * 4                # f32 accumulator scratch
        + 2 * tm_eff * th * 4               # f32 fc1 block + cast copy
    )
    cap = _vmem_capacity_bytes()
    vmem_limit = int(min(max(32 << 20, needed + (8 << 20)),
                         max(cap - (4 << 20), 32 << 20)))

    # Advisory cost estimate (weights are re-streamed per token tile).
    cost = pl.CostEstimate(
        flops=2 * Tp * Cp * Hp + 2 * Tp * Hp * Coutp,
        transcendentals=Tp * Hp if approx_gelu else 0,
        bytes_accessed=(
            Tp * Cp * x_it
            + num_t * (Cp * Hp + Hp + Hp * Coutp) * w_it
            + Coutp * w_it
            + Tp * Coutp * o_it
        ),
    )

    single_w = num_h == 1  # weight/bias blocks constant over the whole grid
    kernel = functools.partial(_mlp_kernel, approx_gelu=approx_gelu)

    out2d = pl.pallas_call(
        kernel,
        out_shape=jax.ShapeDtypeStruct((Tp, Coutp), out_dtype),
        grid_spec=pltpu.PrefetchScalarGridSpec(
            num_scalar_prefetch=0,
            grid=(num_t, num_h),
            in_specs=[
                pl.BlockSpec((tm_eff, Cp), lambda i, h: (i, 0)),      # x tile
                _spec((Cp, th), lambda i, h: (0, h), single_w),       # w1 col-block
                _spec((1, th), lambda i, h: (0, h), single_w),        # b1 block
                _spec((th, Coutp), lambda i, h: (h, 0), single_w),    # w2 row-block
                _spec((1, Coutp), lambda i, h: (0, 0), True),         # b2 (constant)
            ],
            out_specs=pl.BlockSpec((tm_eff, Coutp), lambda i, h: (i, 0)),
            scratch_shapes=[pltpu.VMEM((tm_eff, Coutp), jnp.float32)],
        ),
        compiler_params=pltpu.CompilerParams(
            dimension_semantics=("parallel", "arbitrary"),
            vmem_limit_bytes=vmem_limit,
        ),
        cost_estimate=cost,
    )(x2d, w1p, b1p, w2p, b2p)

    return out2d[:T, :out_features].reshape(lead_shape + (out_features,))


@functools.partial(
    jax.jit,
    static_argnames=("out_features", "th", "tm", "approx_gelu", "compute_dtype"),
)
def mlp_pallas_padded(x, w1p, b1p, w2p, b2p, *, out_features, th, tm=256,
                      approx_gelu=False, compute_dtype=None):
    """Forward with pre-padded params (pad_mlp_params). x: (..., C)."""
    return _mlp_forward(x, w1p, b1p, w2p, b2p, out_features=out_features, th=th,
                        tm=tm, approx_gelu=approx_gelu, compute_dtype=compute_dtype)


def mlp_pallas(x, w1, b1, w2, b2, *, tm=256, th=512, approx_gelu=False,
               compute_dtype=None):
    """One-shot convenience (pads params every call).  For repeated use, call
    pad_mlp_params once and reuse mlp_pallas_padded."""
    (w1p, b1p, w2p, b2p), dims = pad_mlp_params(
        w1, b1, w2, b2, th=th, compute_dtype=compute_dtype)
    return mlp_pallas_padded(x, w1p, b1p, w2p, b2p, out_features=dims["Cout"],
                             th=dims["th"], tm=tm, approx_gelu=approx_gelu,
                             compute_dtype=compute_dtype)


def mlp_reference(x, w1, b1, w2, b2):
    h = x @ w1 + b1
    h = 0.5 * h * (1.0 + jax.lax.erf(h / jnp.sqrt(2.0)))
    return h @ w2 + b2


if __name__ == "__main__":
    # Small shapes consistent with the module: tokens (B, N, C), hidden expansion.
    B, N, C = 2, 8, 16          # batch, seq, in_features
    H = 32                      # hidden_features
    Cout = C                    # out_features defaults to in_features

    key = jax.random.PRNGKey(0)
    kx, k1, kb1, k2, kb2 = jax.random.split(key, 5)

    x = jax.random.normal(kx, (B, N, C), dtype=jnp.float32)
    w1 = jax.random.normal(k1, (C, H), dtype=jnp.float32) * 0.02
    b1 = jax.random.normal(kb1, (H,), dtype=jnp.float32) * 0.02
    w2 = jax.random.normal(k2, (H, Cout), dtype=jnp.float32) * 0.02
    b2 = jax.random.normal(kb2, (Cout,), dtype=jnp.float32) * 0.02

    # Pad parameters once (outside the jitted forward), then run the kernel.
    (w1p, b1p, w2p, b2p), dims = pad_mlp_params(w1, b1, w2, b2)
    out = mlp_pallas_padded(x, w1p, b1p, w2p, b2p,
                            out_features=dims["Cout"], th=dims["th"])
    out = jax.block_until_ready(out)

    ref = mlp_reference(x, w1, b1, w2, b2)
    assert out.shape == (B, N, Cout)
    assert jnp.allclose(out, ref, atol=1e-5, rtol=1e-5)

    print("KERNEL_OK")
</pallas_src>

<mosaic_0001>
module attributes {stable_mosaic.version = 11 : i64} {
  func.func @_mlp_kernel(%arg0: i32, %arg1: i32, %arg2: memref<16x128xf32, #tpu.memory_space<vmem>>, %arg3: memref<128x128xf32, #tpu.memory_space<vmem>>, %arg4: memref<1x128xf32, #tpu.memory_space<vmem>>, %arg5: memref<128x128xf32, #tpu.memory_space<vmem>>, %arg6: memref<1x128xf32, #tpu.memory_space<vmem>>, %arg7: memref<16x128xf32, #tpu.memory_space<vmem>>, %arg8: memref<16x128xf32, #tpu.memory_space<vmem>>) attributes {dimension_semantics = [#tpu.dimension_semantics<parallel>, #tpu.dimension_semantics<arbitrary>], iteration_bounds = array<i64: 1, 1>, scalar_prefetch = 0 : i64, scratch_operands = 1 : i64, tpu.core_type = #tpu.core_type<tc>, window_params = [{transform_indices = @transform_0, window_bounds = array<i64: 16, 128>}, {pipeline_mode = #tpu.pipeline_mode<synchronous>, transform_indices = @transform_1, window_bounds = array<i64: 128, 128>}, {pipeline_mode = #tpu.pipeline_mode<synchronous>, transform_indices = @transform_2, window_bounds = array<i64: 1, 128>}, {pipeline_mode = #tpu.pipeline_mode<synchronous>, transform_indices = @transform_3, window_bounds = array<i64: 128, 128>}, {pipeline_mode = #tpu.pipeline_mode<synchronous>, transform_indices = @transform_4, window_bounds = array<i64: 1, 128>}, {transform_indices = @transform_5, window_bounds = array<i64: 16, 128>}]} {
    %c0_i32 = arith.constant 0 : i32
    %0 = arith.cmpi eq, %arg1, %c0_i32 : i32
    %1 = arith.extui %0 : i1 to i32
    %c0_i32_0 = arith.constant 0 : i32
    %2 = arith.cmpi ne, %1, %c0_i32_0 : i32
    scf.if %2 {
      %cst_18 = arith.constant 0.000000e+00 : f32
      %25 = vector.broadcast %cst_18 : f32 to vector<16x128xf32>
      %c0_19 = arith.constant 0 : index
      %c0_20 = arith.constant 0 : index
      %26 = vector.load %arg8[%c0_19, %c0_20] : memref<16x128xf32, #tpu.memory_space<vmem>>, vector<16x128xf32>
      tpu.vector_store %arg8[%c0_19, %c0_20], %25 {strides = array<i32>} : memref<16x128xf32, #tpu.memory_space<vmem>>, vector<16x128xf32>,
    } else {
    }
    %c0 = arith.constant 0 : index
    %c0_1 = arith.constant 0 : index
    %3 = vector.load %arg2[%c0, %c0_1] : memref<16x128xf32, #tpu.memory_space<vmem>>, vector<16x128xf32>
    %c0_2 = arith.constant 0 : index
    %c0_3 = arith.constant 0 : index
    %4 = vector.load %arg3[%c0_2, %c0_3] : memref<128x128xf32, #tpu.memory_space<vmem>>, vector<128x128xf32>
    %cst = arith.constant dense<0.000000e+00> : vector<16x128xf32>
    %5 = tpu.matmul %3, %4, %cst {dimension_numbers = #tpu.dot_dimension_numbers<[1], [0], [0], [1], [0, 0, 1, 1], [], []>} : vector<16x128xf32>, vector<128x128xf32>, vector<16x128xf32> -> vector<16x128xf32>
    %c0_4 = arith.constant 0 : index
    %c0_5 = arith.constant 0 : index
    %6 = vector.load %arg4[%c0_4, %c0_5] : memref<1x128xf32, #tpu.memory_space<vmem>>, vector<1x128xf32>
    %7 = vector.broadcast %6 : vector<1x128xf32> to vector<16x128xf32>
    %8 = arith.addf %5, %7 : vector<16x128xf32>
    %cst_6 = arith.constant 5.000000e-01 : f32
    %9 = vector.broadcast %cst_6 : f32 to vector<16x128xf32>
    %10 = arith.mulf %9, %8 : vector<16x128xf32>
    %cst_7 = arith.constant 0.707106769 : f32
    %11 = vector.broadcast %cst_7 : f32 to vector<16x128xf32>
    %12 = arith.mulf %8, %11 : vector<16x128xf32>
    %13 = math.erf %12 : vector<16x128xf32>
    %cst_8 = arith.constant 1.000000e+00 : f32
    %14 = vector.broadcast %cst_8 : f32 to vector<16x128xf32>
    %15 = arith.addf %14, %13 : vector<16x128xf32>
    %16 = arith.mulf %10, %15 : vector<16x128xf32>
    %c0_9 = arith.constant 0 : index
    %c0_10 = arith.constant 0 : index
    %17 = vector.load %arg8[%c0_9, %c0_10] : memref<16x128xf32, #tpu.memory_space<vmem>>, vector<16x128xf32>
    %c0_11 = arith.constant 0 : index
    %c0_12 = arith.constant 0 : index
    %18 = vector.load %arg5[%c0_11, %c0_12] : memref<128x128xf32, #tpu.memory_space<vmem>>, vector<128x128xf32>
    %cst_13 = arith.constant dense<0.000000e+00> : vector<16x128xf32>
    %19 = tpu.matmul %16, %18, %cst_13 {dimension_numbers = #tpu.dot_dimension_numbers<[1], [0], [0], [1], [0, 0, 1, 1], [], []>} : vector<16x128xf32>, vector<128x128xf32>, vector<16x128xf32> -> vector<16x128xf32>
    %20 = arith.addf %17, %19 : vector<16x128xf32>
    %c0_14 = arith.constant 0 : index
    %c0_15 = arith.constant 0 : index
    %21 = vector.load %arg8[%c0_14, %c0_15] : memref<16x128xf32, #tpu.memory_space<vmem>>, vector<16x128xf32>
    tpu.vector_store %arg8[%c0_14, %c0_15], %20 {strides = array<i32>} : memref<16x128xf32, #tpu.memory_space<vmem>>, vector<16x128xf32>,
    %c0_i32_16 = arith.constant 0 : i32
    %22 = arith.cmpi eq, %arg1, %c0_i32_16 : i32
    %23 = arith.extui %22 : i1 to i32
    %c0_i32_17 = arith.constant 0 : i32
    %24 = arith.cmpi ne, %23, %c0_i32_17 : i32
    scf.if %24 {
      %c0_18 = arith.constant 0 : index
      %c0_19 = arith.constant 0 : index
      %25 = vector.load %arg8[%c0_18, %c0_19] : memref<16x128xf32, #tpu.memory_space<vmem>>, vector<16x128xf32>
      %c0_20 = arith.constant 0 : index
      %c0_21 = arith.constant 0 : index
      %26 = vector.load %arg6[%c0_20, %c0_21] : memref<1x128xf32, #tpu.memory_space<vmem>>, vector<1x128xf32>
      %27 = vector.broadcast %26 : vector<1x128xf32> to vector<16x128xf32>
      %28 = arith.addf %25, %27 : vector<16x128xf32>
      %c0_22 = arith.constant 0 : index
      %c0_23 = arith.constant 0 : index
      %29 = vector.load %arg7[%c0_22, %c0_23] : memref<16x128xf32, #tpu.memory_space<vmem>>, vector<16x128xf32>
      tpu.vector_store %arg7[%c0_22, %c0_23], %28 {strides = array<i32>} : memref<16x128xf32, #tpu.memory_space<vmem>>, vector<16x128xf32>,
    } else {
    }
    return
  }
  func.func @transform_0(%arg0: i32, %arg1: i32) -> (i32, i32) {
    %c0_i32 = arith.constant 0 : i32
    %c0_i32_0 = arith.constant 0 : i32
    return %arg0, %c0_i32 : i32, i32
  }
  func.func @transform_1(%arg0: i32, %arg1: i32) -> (i32, i32) {
    %c0_i32 = arith.constant 0 : i32
    %c0_i32_0 = arith.constant 0 : i32
    return %c0_i32, %arg1 : i32, i32
  }
  func.func @transform_2(%arg0: i32, %arg1: i32) -> (i32, i32) {
    %c0_i32 = arith.constant 0 : i32
    %c0_i32_0 = arith.constant 0 : i32
    return %c0_i32, %arg1 : i32, i32
  }
  func.func @transform_3(%arg0: i32, %arg1: i32) -> (i32, i32) {
    %c0_i32 = arith.constant 0 : i32
    %c0_i32_0 = arith.constant 0 : i32
    return %arg1, %c0_i32 : i32, i32
  }
  func.func @transform_4(%arg0: i32, %arg1: i32) -> (i32, i32) {
    %c0_i32 = arith.constant 0 : i32
    %c0_i32_0 = arith.constant 0 : i32
    %c0_i32_1 = arith.constant 0 : i32
    return %c0_i32, %c0_i32_0 : i32, i32
  }
  func.func @transform_5(%arg0: i32, %arg1: i32) -> (i32, i32) {
    %c0_i32 = arith.constant 0 : i32
    %c0_i32_0 = arith.constant 0 : i32
    return %arg0, %c0_i32 : i32, i32
  }
}

</mosaic_0001>

<bundles_post_ra>
// kernel: mlp_pallas_padded.1
= control target key start
LH: loop header
LB: loop body
LE: loop exit
PB: predicated region body
PF: predicated region fallthrough
CT: control target
= control target key end

     0   :  { %10 = vsyncpa [#allocation4], 0  ;;  %s501_s0 = inlined_call_operand.vmem [shape: f32[16,128], index: 0, kind: input, shape index: {}]   ;;  %s502_s1 = inlined_call_operand.hbm [shape: f32[128,128], index: 1, kind: input, shape index: {}]   ;;  %s503_s2 = inlined_call_operand.vmem [shape: f32[1,128], index: 2, kind: input, shape index: {}]   ;;  %s504_s3 = inlined_call_operand.hbm [shape: f32[128,128], index: 3, kind: input, shape index: {}]   ;;  %s505_s4 = inlined_call_operand.vmem [shape: f32[1,128], index: 4, kind: input, shape index: {}]   ;;  %s506_s5 = inlined_call_operand.vmem [shape: f32[16,128], index: 5, kind: output, shape index: {}]  }
   0x1   :  { %11 = vsyncpa [#allocation6], 0  ;;  %s443_s18 = smov [#allocation3]  }
   0x2   :  { %s19_s19 = sshll.u32 %s443_s18, 4  ;;  %s20_s19 = int_to_ptr.vmem [resolvable:$true] %s19_s19 }
   0x3   :  { %s407_s20 = scalar_lea.vmem %s20_s19, 2048  ;;  %p412_p1 = scmp.lt.s32.totalorder %s20_s19, %s20_s19 }
   0x4   :  { %p408_p0 = scmp.ne.s32.totalorder %s20_s19, %s407_s20  ;;  %p413_p2 = scmp.lt.s32.totalorder %s407_s20, %s407_s20 }
   0x6   :  { %p414_p3 = por %p413_p2, %p412_p1 }
   0x8   :  { %p415_p4 = pnand %p414_p3, %p408_p0 }
   0xa   :  { %418 = shalt.err (!%p415_p4)
}
   0xb   :  { %s444_s21 = smov 128   ;;  %s445_s22 = smov 8  }
   0xc   :  { %25 = dma.hbm_to_vmem [thread:$0]  %s502_s1, 2048, %s20_s19, [#allocation4], %s444_s21, %s444_s21, %s445_s22  }
   0xd   :  { %s446_s25 = smov [#allocation5]  }
   0xe   :  { %s33_s26 = sshll.u32 %s446_s25, 4  ;;  %s34_s26 = int_to_ptr.vmem [resolvable:$true] %s33_s26 }
   0xf   :  { %s427_s27 = scalar_lea.vmem %s34_s26, 2048  ;;  %p432_p6 = scmp.lt.s32.totalorder %s34_s26, %s34_s26 }
  0x10   :  { %p428_p5 = scmp.ne.s32.totalorder %s34_s26, %s427_s27  ;;  %p433_p7 = scmp.lt.s32.totalorder %s427_s27, %s427_s27 }
  0x12   :  { %p434_p8 = por %p433_p7, %p432_p6 }
  0x14   :  { %p435_p9 = pnand %p434_p8, %p428_p5 }
  0x16   :  { %438 = shalt.err (!%p435_p9)
}
  0x17   :  { %39 = dma.hbm_to_vmem [thread:$0]  %s504_s3, 2048, %s34_s26, [#allocation6], %s444_s21, %s444_s21, %s445_s22  }
  0x18   :  { %439 = dma.done.wait [#allocation4], 2048  }
  0x19   :  { %440 = vsyncadd [#allocation4], 4294965248 }
  0x1a   :  { %441 = dma.done.wait [#allocation6], 2048  }
  0x1b   :  { %442 = vsyncadd [#allocation6], 4294965248  ;;  %v71_v0 = vld [vmem:[#allocation3 + $0x78] sm:$0xff]  ;;  %v70_v1 = vld [vmem:[#allocation3 + $0x70] sm:$0xff] }
  0x1c   :  { %321 = vmatprep.subr.mxu0 %v71_v0  ;;  %v69_v2 = vld [vmem:[#allocation3 + $0x68] sm:$0xff]  ;;  %v68_v3 = vld [vmem:[#allocation3 + $0x60] sm:$0xff]  ;;  %v67_v5 = vld [vmem:[#allocation3 + $0x58] sm:$0xff] }
  0x1d   :  { %322 = vmatpush3.msra.mxu0 %v71_v0  ;;  %v54_v4 = vld [vmem:[%s501_s0] sm:$0xff]  ;;  %v181_v6 = vld [vmem:[#allocation5 + $0x78] sm:$0xff]  ;;  %v180_v7 = vld [vmem:[#allocation5 + $0x70] sm:$0xff] }
  0x1e   :  { %323 = vmatprep.subr.mxu0 %v70_v1  ;;  %353 = vmatprep.mubr.f32.mxu0 %v54_v4  ;;  %v66_v8 = vld [vmem:[#allocation3 + $0x50] sm:$0xff]  ;;  %v179_v9 = vld [vmem:[#allocation5 + $0x68] sm:$0xff]  ;;  %v64_v11 = vld [vmem:[#allocation3 + $0x40] sm:$0xff] }
  0x1f   :  { %324 = vmatpush3.msra.mxu0 %v70_v1  ;;  %356 = vmatprep.subr.mxu1 %v181_v6  ;;  %v65_v10 = vld [vmem:[#allocation3 + $0x48] sm:$0xff]  ;;  %v63_v12 = vld [vmem:[#allocation3 + $0x38] sm:$0xff]  ;;  %v62_v13 = vld [vmem:[#allocation3 + $0x30] sm:$0xff] }
  0x20   :  { %325 = vmatprep.subr.mxu0 %v69_v2  ;;  %357 = vmatpush3.msra.mxu1 %v181_v6  ;;  %v61_v14 = vld [vmem:[#allocation3 + $0x28] sm:$0xff]  ;;  %v60_v15 = vld [vmem:[#allocation3 + $0x20] sm:$0xff]  ;;  %v59_v16 = vld [vmem:[#allocation3 + $0x18] sm:$0xff] }
  0x21   :  { %326 = vmatpush3.msra.mxu0 %v69_v2  ;;  %358 = vmatprep.subr.mxu1 %v180_v7  ;;  %v58_v17 = vld [vmem:[#allocation3 + $0x10] sm:$0xff]  ;;  %v57_v18 = vld [vmem:[#allocation3 + $0x8] sm:$0xff]  ;;  %v56_v19 = vld [vmem:[#allocation3] sm:$0xff] }
  0x22   :  { %327 = vmatprep.subr.mxu0 %v68_v3  ;;  %359 = vmatpush3.msra.mxu1 %v180_v7  ;;  %v55_v20 = vld [vmem:[%s501_s0 + $0x8] sm:$0xff]  ;;  %v178_v21 = vld [vmem:[#allocation5 + $0x60] sm:$0xff]  ;;  %v177_v22 = vld [vmem:[#allocation5 + $0x58] sm:$0xff] }
  0x23   :  { %328 = vmatpush3.msra.mxu0 %v68_v3  ;;  %360 = vmatprep.subr.mxu1 %v179_v9  ;;  %v176_v23 = vld [vmem:[#allocation5 + $0x50] sm:$0xff]  ;;  %v175_v24 = vld [vmem:[#allocation5 + $0x48] sm:$0xff]  ;;  %v174_v25 = vld [vmem:[#allocation5 + $0x40] sm:$0xff] }
  0x24   :  { %329 = vmatprep.subr.mxu0 %v67_v5  ;;  %361 = vmatpush3.msra.mxu1 %v179_v9  ;;  %v173_v26 = vld [vmem:[#allocation5 + $0x38] sm:$0xff]  ;;  %v172_v27 = vld [vmem:[#allocation5 + $0x30] sm:$0xff]  ;;  %v171_v28 = vld [vmem:[#allocation5 + $0x28] sm:$0xff] }
  0x25   :  { %330 = vmatpush3.msra.mxu0 %v67_v5  ;;  %362 = vmatprep.subr.mxu1 %v178_v21  ;;  %v170_v29 = vld [vmem:[#allocation5 + $0x20] sm:$0xff]  ;;  %v169_v30 = vld [vmem:[#allocation5 + $0x18] sm:$0xff]  ;;  %v168_v31 = vld [vmem:[#allocation5 + $0x10] sm:$0xff] }
  0x26   :  { %331 = vmatprep.subr.mxu0 %v66_v8  ;;  %363 = vmatpush3.msra.mxu1 %v178_v21  ;;  %v167_v32 = vld [vmem:[#allocation5 + $0x8] sm:$0xff]  ;;  %v166_v33 = vld [vmem:[#allocation5] sm:$0xff] }
  0x27   :  { %332 = vmatpush3.msra.mxu0 %v66_v8  ;;  %364 = vmatprep.subr.mxu1 %v177_v22  ;;  %v283_v34 = vld [vmem:[%s503_s2] ss:$0 sm:$0xff] }
  0x28   :  { %333 = vmatprep.subr.mxu0 %v65_v10  ;;  %365 = vmatpush3.msra.mxu1 %v177_v22  ;;  %v284_v49 = vld [vmem:[%s505_s4] ss:$0 sm:$0xff] }
  0x29   :  { %334 = vmatpush3.msra.mxu0 %v65_v10  ;;  %366 = vmatprep.subr.mxu1 %v176_v23 }
  0x2a   :  { %335 = vmatprep.subr.mxu0 %v64_v11  ;;  %367 = vmatpush3.msra.mxu1 %v176_v23 }
  0x2b   :  { %336 = vmatpush3.msra.mxu0 %v64_v11  ;;  %368 = vmatprep.subr.mxu1 %v175_v24 }
  0x2c   :  { %337 = vmatprep.subr.mxu0 %v63_v12  ;;  %369 = vmatpush3.msra.mxu1 %v175_v24 }
  0x2d   :  { %338 = vmatpush3.msra.mxu0 %v63_v12  ;;  %370 = vmatprep.subr.mxu1 %v174_v25 }
  0x2e   :  { %339 = vmatprep.subr.mxu0 %v62_v13  ;;  %371 = vmatpush3.msra.mxu1 %v174_v25 }
  0x2f   :  { %340 = vmatpush3.msra.mxu0 %v62_v13  ;;  %372 = vmatprep.subr.mxu1 %v173_v26 }
  0x30   :  { %341 = vmatprep.subr.mxu0 %v61_v14  ;;  %373 = vmatpush3.msra.mxu1 %v173_v26 }
  0x31   :  { %342 = vmatpush3.msra.mxu0 %v61_v14  ;;  %374 = vmatprep.subr.mxu1 %v172_v27 }
  0x32   :  { %343 = vmatprep.subr.mxu0 %v60_v15  ;;  %375 = vmatpush3.msra.mxu1 %v172_v27 }
  0x33   :  { %344 = vmatpush3.msra.mxu0 %v60_v15  ;;  %376 = vmatprep.subr.mxu1 %v171_v28 }
  0x34   :  { %345 = vmatprep.subr.mxu0 %v59_v16  ;;  %377 = vmatpush3.msra.mxu1 %v171_v28 }
  0x35   :  { %346 = vmatpush3.msra.mxu0 %v59_v16  ;;  %378 = vmatprep.subr.mxu1 %v170_v29 }
  0x36   :  { %347 = vmatprep.subr.mxu0 %v58_v17  ;;  %379 = vmatpush3.msra.mxu1 %v170_v29 }
  0x37   :  { %348 = vmatpush3.msra.mxu0 %v58_v17  ;;  %380 = vmatprep.subr.mxu1 %v169_v30 }
  0x38   :  { %349 = vmatprep.subr.mxu0 %v57_v18  ;;  %381 = vmatpush3.msra.mxu1 %v169_v30 }
  0x39   :  { %350 = vmatpush3.msra.mxu0 %v57_v18  ;;  %382 = vmatprep.subr.mxu1 %v168_v31 }
  0x3a   :  { %351 = vmatprep.subr.mxu0 %v56_v19  ;;  %383 = vmatpush3.msra.mxu1 %v168_v31 }
  0x3b   :  { %352 = vmatpush3.msra.mxu0 %v56_v19  ;;  %384 = vmatprep.subr.mxu1 %v167_v32 }
  0x3c   :  { %354 = vmatmul.mubr.f32.vlgmr.msra.gmra.mxu0 %v55_v20  ;;  %385 = vmatpush3.msra.mxu1 %v167_v32 }
  0x3d   :  { %386 = vmatprep.subr.mxu1 %v166_v33 }
  0x3e   :  { %387 = vmatpush3.msra.mxu1 %v166_v33 }
  0xfc   :  { %v355_v35 = vpop.f32.mrf.mxu0 }
  0xfd   :  { %v151_v36 = vadd.f32 %v355_v35, %v283_v34 }
  0xfe   :  { %v145_v37 = vpop.f32.mrf.mxu0 }
  0xff   :  { %v157_v38 = vmul.f32 0.70710677, %v151_v36  ;;  %v146_v39 = vadd.f32 %v283_v34, %v145_v37  ;;  %v155_v46 = vmul.f32 0.5, %v151_v36 }
 0x101   :  { %395 = verf.f32 %v157_v38  ;;  %v156_v40 = vmul.f32 0.70710677, %v146_v39  ;;  %v154_v44 = vmul.f32 0.5, %v146_v39 }
 0x103   :  { %397 = verf.f32 %v156_v40 }
 0x10e   :  { %v396_v41 = vpop.eup %395 }
 0x10f   :  { %v161_v43 = vadd.f32 1.0, %v396_v41 }
 0x110   :  { %v398_v42 = vpop.eup %397 }
 0x111   :  { %v160_v45 = vadd.f32 1.0, %v398_v42  ;;  %v163_v48 = vmul.f32 %v161_v43, %v155_v46 }
 0x113   :  { %v162_v47 = vmul.f32 %v160_v45, %v154_v44 }
 0x115   :  { %388 = vmatprep.mubr.f32.mxu1 %v162_v47 }
 0x116   :  { %389 = vmatmul.mubr.f32.vlgmr.msra.gmra.mxu1 %v163_v48 }
 0x1d6   :  { %v390_v50 = vpop.f32.mrf.mxu1 }
 0x1d7   :  { %v274_v51 = vadd.f32 %v390_v50, %v284_v49 }
 0x1d8   :  { %v248_v52 = vpop.f32.mrf.mxu1 }
 0x1d9   :  { %276 = vst [vmem:[%s506_s5 + $0x8] sm:$0xff] %v274_v51  ;;  %v273_v53 = vadd.f32 %v284_v49, %v248_v52 }
 0x1db   :  { %275 = vst [vmem:[%s506_s5] sm:$0xff] %v273_v53 }
 0x1dc   :  { %281 = vsyncpa [#allocation4], 1 }
 0x1dd   :  { %282 = vsyncpa [#allocation6], 1 }

</bundles_post_ra>
